<compile_context>
chip_gen: v7x
topology: tpu7x:2x2x1
jax: 0.10.0
libtpu: 0.0.40
codegen_flags: <defaults>
</compile_context>

<pallas_src>
import functools

import jax
import jax.numpy as jnp
from jax.experimental import pallas as pl
from jax.experimental.pallas import tpu as pltpu

H1, H2 = 64, 32  # hidden widths from the PyTorch module


def qnetwork_kernel(x_ref, w1_ref, b1_ref, w2_ref, b2_ref, w3_ref, b3_ref, o_ref):
    # Three MXU matmuls (low-precision operands, f32 accumulation) + two f32 ReLUs,
    # fully fused on one (tile_b, state_dim) batch tile.
    cd = w1_ref.dtype                      # MXU operand dtype (bf16 or f32)
    x = x_ref[...].astype(cd)              # in-kernel cast: hidden under MXU work
    h1 = jnp.dot(x, w1_ref[...], preferred_element_type=jnp.float32) + b1_ref[...]
    h1 = jnp.maximum(h1, 0.0)
    h2 = jnp.dot(h1.astype(cd), w2_ref[...],
                 preferred_element_type=jnp.float32) + b2_ref[...]
    h2 = jnp.maximum(h2, 0.0)
    out = jnp.dot(h2.astype(cd), w3_ref[...],
                  preferred_element_type=jnp.float32) + b3_ref[...]
    o_ref[...] = out.astype(o_ref.dtype)


@functools.partial(jax.jit, static_argnames=("tile_b", "compute_dtype"))
def qnetwork_forward(x, params, *, tile_b=4096, compute_dtype=jnp.bfloat16):
    """x: (B, state_dim) float32. params: dict of (in,out) weights and (1,out) biases.

    compute_dtype is the MXU operand dtype (bf16 recommended on v6e/v7x; pass
    jnp.float32 to stay all-f32, e.g. on v5e if profiling shows cast filler).
    """
    w1, b1 = params["w1"], params["b1"]
    w2, b2 = params["w2"], params["b2"]
    w3, b3 = params["w3"], params["b3"]
    B, state_dim = x.shape
    action_dim = w3.shape[1]

    # Batch tiling.  If the whole batch fits in one tile, use a single full-array
    # block (any B is legal when block dims equal the full array dims) -> no pad,
    # no extra HBM pass.  Otherwise tiles must be multiples of 8 (sublane rule)
    # and the ragged tail is zero-padded and sliced off below.
    if B <= tile_b:
        tile = B
        num_tiles = 1
        b_pad = B
    else:
        tile = max(8, (tile_b // 8) * 8)
        num_tiles = pl.cdiv(B, tile)
        b_pad = num_tiles * tile
        if b_pad != B:
            x = jnp.pad(x, ((0, b_pad - B), (0, 0)))  # zero rows; sliced off below

    # Weights are tiny and fetched once -> cast them in the wrapper (halves their
    # already-small DMA).  Biases stay f32 so accumulate/bias-add/ReLU are f32.
    w1c, w2c, w3c = (w.astype(compute_dtype) for w in (w1, w2, w3))

    def const_spec(a):  # full-array block, VMEM-resident across all grid steps
        return pl.BlockSpec(a.shape, lambda i: (0, 0))

    itemsize = jnp.dtype(compute_dtype).itemsize
    param_bytes = (sum(int(a.size) for a in (w1c, w2c, w3c)) * itemsize
                   + sum(int(a.size) for a in (b1, b2, b3)) * 4)
    flops = 2 * b_pad * (state_dim * H1 + H1 * H2 + H2 * action_dim)
    bytes_accessed = (b_pad * state_dim * 4        # x read (f32)
                      + b_pad * action_dim * 4     # out write (f32)
                      + param_bytes)

    # Explicit VMEM budget: double-buffered x/out tiles + f32/bf16 activation
    # intermediates + params + headroom; capped well under v7x's 64 MiB.
    work_bytes = tile * (2 * (state_dim * 4 + action_dim * 4)
                         + (H1 + H2) * (4 + itemsize))
    vmem_limit = int(min(max(2 * work_bytes + param_bytes + (4 << 20), 16 << 20),
                         48 << 20))

    out_padded = pl.pallas_call(
        qnetwork_kernel,
        out_shape=jax.ShapeDtypeStruct((b_pad, action_dim), jnp.float32),
        grid=(num_tiles,),
        in_specs=[
            pl.BlockSpec((tile, state_dim), lambda i: (i, 0)),
            const_spec(w1c), const_spec(b1),
            const_spec(w2c), const_spec(b2),
            const_spec(w3c), const_spec(b3),
        ],
        out_specs=pl.BlockSpec((tile, action_dim), lambda i: (i, 0)),
        compiler_params=pltpu.CompilerParams(
            dimension_semantics=("parallel",),  # shard batch tiles across v7x's 2 TCs
            vmem_limit_bytes=vmem_limit,
        ),
        cost_estimate=pl.CostEstimate(
            flops=flops, transcendentals=0, bytes_accessed=bytes_accessed),
    )(x, w1c, b1, w2c, b2, w3c, b3)

    return out_padded if b_pad == B else out_padded[:B]


def init_params(key, state_dim, action_dim):
    """Deterministic synthetic init (matches nn.Linear shapes; stored transposed)."""
    ks = jax.random.split(key, 6)

    def lin(kw, kb, fan_in, fan_out):
        bound = 1.0 / jnp.sqrt(fan_in)
        w = jax.random.uniform(kw, (fan_in, fan_out), jnp.float32, -bound, bound)
        b = jax.random.uniform(kb, (1, fan_out), jnp.float32, -bound, bound)
        return w, b

    w1, b1 = lin(ks[0], ks[1], state_dim, H1)
    w2, b2 = lin(ks[2], ks[3], H1, H2)
    w3, b3 = lin(ks[4], ks[5], H2, action_dim)
    return {"w1": w1, "b1": b1, "w2": w2, "b2": b2, "w3": w3, "b3": b3}


def qnetwork_ref(x, p, compute_dtype=jnp.float32):
    """Pure-JAX reference with the same operand precision as the kernel."""
    cd = compute_dtype
    h1 = jnp.maximum(
        jnp.dot(x.astype(cd), p["w1"].astype(cd),
                preferred_element_type=jnp.float32) + p["b1"], 0.0)
    h2 = jnp.maximum(
        jnp.dot(h1.astype(cd), p["w2"].astype(cd),
                preferred_element_type=jnp.float32) + p["b2"], 0.0)
    return jnp.dot(h2.astype(cd), p["w3"].astype(cd),
                   preferred_element_type=jnp.float32) + p["b3"]


if __name__ == "__main__":
    key = jax.random.PRNGKey(0)
    k_x, k_p, k_x2 = jax.random.split(key, 3)

    batch, state_dim, action_dim = 2, 8, 4
    x = jax.random.normal(k_x, (batch, state_dim), jnp.float32)
    params = init_params(k_p, state_dim, action_dim)

    out = jax.block_until_ready(qnetwork_forward(x, params))
    assert out.shape == (batch, action_dim)
    # Match a reference with the same bf16-operand / f32-accumulate precision...
    ref_bf16 = qnetwork_ref(x, params, jnp.bfloat16)
    assert jnp.allclose(out, ref_bf16, atol=5e-4, rtol=5e-4)
    # ...and stay close to the full-f32 PyTorch-equivalent forward.
    ref_f32 = qnetwork_ref(x, params, jnp.float32)
    assert jnp.allclose(out, ref_f32, atol=3e-2, rtol=3e-2)

    # Exercise the multi-tile grid + ragged-tail padding path (B not a tile multiple).
    x2 = jax.random.normal(k_x2, (100, state_dim), jnp.float32)
    out2 = jax.block_until_ready(qnetwork_forward(x2, params, tile_b=64))
    assert out2.shape == (100, action_dim)
    ref2 = qnetwork_ref(x2, params, jnp.bfloat16)
    assert jnp.allclose(out2, ref2, atol=5e-4, rtol=5e-4)

    print("KERNEL_OK")
</pallas_src>

<mosaic_0001>
module attributes {stable_mosaic.version = 11 : i64} {
  func.func @qnetwork_kernel(%arg0: i32, %arg1: memref<2x8xf32, #tpu.memory_space<vmem>>, %arg2: memref<8x64xbf16, #tpu.memory_space<vmem>>, %arg3: memref<1x64xf32, #tpu.memory_space<vmem>>, %arg4: memref<64x32xbf16, #tpu.memory_space<vmem>>, %arg5: memref<1x32xf32, #tpu.memory_space<vmem>>, %arg6: memref<32x4xbf16, #tpu.memory_space<vmem>>, %arg7: memref<1x4xf32, #tpu.memory_space<vmem>>, %arg8: memref<2x4xf32, #tpu.memory_space<vmem>>) attributes {dimension_semantics = [#tpu.dimension_semantics<parallel>], iteration_bounds = array<i64: 1>, scalar_prefetch = 0 : i64, scratch_operands = 0 : i64, tpu.core_type = #tpu.core_type<tc>, window_params = [{transform_indices = @transform_0, window_bounds = array<i64: 2, 8>}, {pipeline_mode = #tpu.pipeline_mode<synchronous>, transform_indices = @transform_1, window_bounds = array<i64: 8, 64>}, {pipeline_mode = #tpu.pipeline_mode<synchronous>, transform_indices = @transform_2, window_bounds = array<i64: 1, 64>}, {pipeline_mode = #tpu.pipeline_mode<synchronous>, transform_indices = @transform_3, window_bounds = array<i64: 64, 32>}, {pipeline_mode = #tpu.pipeline_mode<synchronous>, transform_indices = @transform_4, window_bounds = array<i64: 1, 32>}, {pipeline_mode = #tpu.pipeline_mode<synchronous>, transform_indices = @transform_5, window_bounds = array<i64: 32, 4>}, {pipeline_mode = #tpu.pipeline_mode<synchronous>, transform_indices = @transform_6, window_bounds = array<i64: 1, 4>}, {transform_indices = @transform_7, window_bounds = array<i64: 2, 4>}]} {
    %c0 = arith.constant 0 : index
    %c0_0 = arith.constant 0 : index
    %0 = vector.load %arg1[%c0, %c0_0] : memref<2x8xf32, #tpu.memory_space<vmem>>, vector<2x8xf32>
    %1 = arith.truncf %0 : vector<2x8xf32> to vector<2x8xbf16>
    %c0_1 = arith.constant 0 : index
    %c0_2 = arith.constant 0 : index
    %2 = vector.load %arg2[%c0_1, %c0_2] : memref<8x64xbf16, #tpu.memory_space<vmem>>, vector<8x64xbf16>
    %cst = arith.constant dense<0.000000e+00> : vector<2x64xf32>
    %3 = tpu.matmul %1, %2, %cst {dimension_numbers = #tpu.dot_dimension_numbers<[1], [0], [0], [1], [0, 0, 1, 1], [], []>} : vector<2x8xbf16>, vector<8x64xbf16>, vector<2x64xf32> -> vector<2x64xf32>
    %c0_3 = arith.constant 0 : index
    %c0_4 = arith.constant 0 : index
    %4 = vector.load %arg3[%c0_3, %c0_4] : memref<1x64xf32, #tpu.memory_space<vmem>>, vector<1x64xf32>
    %5 = vector.broadcast %4 : vector<1x64xf32> to vector<2x64xf32>
    %6 = arith.addf %3, %5 : vector<2x64xf32>
    %cst_5 = arith.constant 0.000000e+00 : f32
    %7 = vector.broadcast %cst_5 : f32 to vector<2x64xf32>
    %8 = arith.maximumf %6, %7 : vector<2x64xf32>
    %9 = arith.truncf %8 : vector<2x64xf32> to vector<2x64xbf16>
    %c0_6 = arith.constant 0 : index
    %c0_7 = arith.constant 0 : index
    %10 = vector.load %arg4[%c0_6, %c0_7] : memref<64x32xbf16, #tpu.memory_space<vmem>>, vector<64x32xbf16>
    %cst_8 = arith.constant dense<0.000000e+00> : vector<2x32xf32>
    %11 = tpu.matmul %9, %10, %cst_8 {dimension_numbers = #tpu.dot_dimension_numbers<[1], [0], [0], [1], [0, 0, 1, 1], [], []>} : vector<2x64xbf16>, vector<64x32xbf16>, vector<2x32xf32> -> vector<2x32xf32>
    %c0_9 = arith.constant 0 : index
    %c0_10 = arith.constant 0 : index
    %12 = vector.load %arg5[%c0_9, %c0_10] : memref<1x32xf32, #tpu.memory_space<vmem>>, vector<1x32xf32>
    %13 = vector.broadcast %12 : vector<1x32xf32> to vector<2x32xf32>
    %14 = arith.addf %11, %13 : vector<2x32xf32>
    %cst_11 = arith.constant 0.000000e+00 : f32
    %15 = vector.broadcast %cst_11 : f32 to vector<2x32xf32>
    %16 = arith.maximumf %14, %15 : vector<2x32xf32>
    %17 = arith.truncf %16 : vector<2x32xf32> to vector<2x32xbf16>
    %c0_12 = arith.constant 0 : index
    %c0_13 = arith.constant 0 : index
    %18 = vector.load %arg6[%c0_12, %c0_13] : memref<32x4xbf16, #tpu.memory_space<vmem>>, vector<32x4xbf16>
    %cst_14 = arith.constant dense<0.000000e+00> : vector<2x4xf32>
    %19 = tpu.matmul %17, %18, %cst_14 {dimension_numbers = #tpu.dot_dimension_numbers<[1], [0], [0], [1], [0, 0, 1, 1], [], []>} : vector<2x32xbf16>, vector<32x4xbf16>, vector<2x4xf32> -> vector<2x4xf32>
    %c0_15 = arith.constant 0 : index
    %c0_16 = arith.constant 0 : index
    %20 = vector.load %arg7[%c0_15, %c0_16] : memref<1x4xf32, #tpu.memory_space<vmem>>, vector<1x4xf32>
    %21 = vector.broadcast %20 : vector<1x4xf32> to vector<2x4xf32>
    %22 = arith.addf %19, %21 : vector<2x4xf32>
    %c0_17 = arith.constant 0 : index
    %c0_18 = arith.constant 0 : index
    %23 = vector.load %arg8[%c0_17, %c0_18] : memref<2x4xf32, #tpu.memory_space<vmem>>, vector<2x4xf32>
    tpu.vector_store %arg8[%c0_17, %c0_18], %22 {strides = array<i32>} : memref<2x4xf32, #tpu.memory_space<vmem>>, vector<2x4xf32>,
    return
  }
  func.func @transform_0(%arg0: i32) -> (i32, i32) {
    %c0_i32 = arith.constant 0 : i32
    %c0_i32_0 = arith.constant 0 : i32
    return %arg0, %c0_i32 : i32, i32
  }
  func.func @transform_1(%arg0: i32) -> (i32, i32) {
    %c0_i32 = arith.constant 0 : i32
    %c0_i32_0 = arith.constant 0 : i32
    %c0_i32_1 = arith.constant 0 : i32
    return %c0_i32, %c0_i32_0 : i32, i32
  }
  func.func @transform_2(%arg0: i32) -> (i32, i32) {
    %c0_i32 = arith.constant 0 : i32
    %c0_i32_0 = arith.constant 0 : i32
    %c0_i32_1 = arith.constant 0 : i32
    return %c0_i32, %c0_i32_0 : i32, i32
  }
  func.func @transform_3(%arg0: i32) -> (i32, i32) {
    %c0_i32 = arith.constant 0 : i32
    %c0_i32_0 = arith.constant 0 : i32
    %c0_i32_1 = arith.constant 0 : i32
    return %c0_i32, %c0_i32_0 : i32, i32
  }
  func.func @transform_4(%arg0: i32) -> (i32, i32) {
    %c0_i32 = arith.constant 0 : i32
    %c0_i32_0 = arith.constant 0 : i32
    %c0_i32_1 = arith.constant 0 : i32
    return %c0_i32, %c0_i32_0 : i32, i32
  }
  func.func @transform_5(%arg0: i32) -> (i32, i32) {
    %c0_i32 = arith.constant 0 : i32
    %c0_i32_0 = arith.constant 0 : i32
    %c0_i32_1 = arith.constant 0 : i32
    return %c0_i32, %c0_i32_0 : i32, i32
  }
  func.func @transform_6(%arg0: i32) -> (i32, i32) {
    %c0_i32 = arith.constant 0 : i32
    %c0_i32_0 = arith.constant 0 : i32
    %c0_i32_1 = arith.constant 0 : i32
    return %c0_i32, %c0_i32_0 : i32, i32
  }
  func.func @transform_7(%arg0: i32) -> (i32, i32) {
    %c0_i32 = arith.constant 0 : i32
    %c0_i32_0 = arith.constant 0 : i32
    return %arg0, %c0_i32 : i32, i32
  }
}

</mosaic_0001>

<bundles_post_ra>
// kernel: qnetwork_forward.1
= control target key start
LH: loop header
LB: loop body
LE: loop exit
PB: predicated region body
PF: predicated region fallthrough
CT: control target
= control target key end

     0   :  { %vm42_vm0 = vcmask 1043456   ;;  %vm38_vm1 = vcmask 64512   ;;  %v337_v1 = vmov 0.0   ;;  %vm338_vm2 = vmmov 0   ;;  %s426_s0 = inlined_call_operand.vmem [shape: f32[2,8], index: 0, kind: input, shape index: {}]   ;;  %s427_s1 = inlined_call_operand.vmem [shape: bf16[8,64], index: 1, kind: input, shape index: {}]   ;;  %s428_s2 = inlined_call_operand.vmem [shape: f32[1,64], index: 2, kind: input, shape index: {}]   ;;  %s429_s3 = inlined_call_operand.vmem [shape: bf16[64,32], index: 3, kind: input, shape index: {}]   ;;  %s430_s4 = inlined_call_operand.vmem [shape: f32[1,32], index: 4, kind: input, shape index: {}]   ;;  %s431_s5 = inlined_call_operand.vmem [shape: bf16[32,4], index: 5, kind: input, shape index: {}]   ;;  %s432_s6 = inlined_call_operand.vmem [shape: f32[1,4], index: 6, kind: input, shape index: {}]   ;;  %s433_s7 = inlined_call_operand.hbm [shape: f32[2,4], index: 7, kind: output, shape index: {}]  }
   0x1   :  { %v30_v0 = vld [vmem:[%s427_s1] sm:$0xf]  ;;  %278 = vmatprep.subr.bf16.mxu0 %v337_v1  ;;  %280 = vmatprep.mubr.msk.bf16.mxu0 %vm338_vm2, %v337_v1  ;;  %v308_v6 = vld [vmem:[%s429_s3 + $0x8] sm:$0xff]  }
   0x2   :  { %v44_v2 = vsel %vm42_vm0, %v30_v0, 0  ;;  %v28_v3 = vld [vmem:[%s426_s0] sm:$0x3]  ;;  %284 = vmatprep.subr.bf16.mxu1 %v337_v1  ;;  %292 = vmatprep.mubr.msk.bf16.mxu1 %vm338_vm2, %v337_v1 }
   0x3   :  { %v307_v4 = vld [vmem:[%s429_s3] sm:$0xff]   ;;  %279 = vmatpush3.bf16.msra.mxu0 %v44_v2  ;;  %v29_v5 = vpack.c.bf16 %v28_v3, %v28_v3 }
   0x4   :  { %285 = vmatpush3.bf16.msra.mxu1 %v307_v4  ;;  %296 = vmatprep.subr.bf16.mxu0 %v337_v1 }
   0x5   :  { %286 = vmatprep.subr.bf16.mxu1 %v337_v1 }
   0x6   :  { %281 = vmatmul.mubr.msk.bf16.vlgmr.msra.gmra.mrb[0].mxu0 %vm38_vm1, %v29_v5 }
   0x7   :  { %300 = vmatprep.mubr.msk.bf16.mxu0 %vm338_vm2, %v337_v1 }
   0x8   :  { %12 = vsyncpa [#allocation3], 0  ;;  %287 = vmatpush3.bf16.msra.mxu1 %v308_v6  ;;  %v309_v7 = vld [vmem:[%s429_s3 + $0x10] sm:$0xff]   ;;  %v310_v8 = vld [vmem:[%s429_s3 + $0x18] sm:$0xff]   ;;  %vm127_vm3 = vcmask 523264   ;;  %vm196_vm4 = vcmask 261120  }
   0x9   :  { %288 = vmatprep.subr.bf16.mxu1 %v337_v1  ;;  %v311_v9 = vld [vmem:[%s431_s5] sm:$0xff]   ;;  %v312_v18 = vld [vmem:[%s431_s5 + $0x8] sm:$0xff]   ;;  %s339_s19 = smov [#allocation2]   ;;  %vm240_vm5 = vcmask 25600  }
   0xa   :  { %297 = vmatpush3.bf16.msra.mxu0 %v311_v9  ;;  %v256_v10 = vld [vmem:[%s428_s2] ss:$0 sm:$0xff]  ;;  %s248_s5 = sshll.u32 %s339_s19, 4  ;;  %s249_s5 = int_to_ptr.vmem [resolvable:$true] %s248_s5 }
   0xb   :  { %298 = vmatprep.subr.bf16.mxu0 %v337_v1  ;;  %v258_v19 = vld [vmem:[%s430_s4] ss:$0 sm:$0xff]  ;;  %s313_s4 = scalar_lea.vmem %s249_s5, 32  ;;  %p318_p1 = scmp.lt.s32.totalorder %s249_s5, %s249_s5 }
   0xc   :  { %289 = vmatpush3.bf16.msra.mxu1 %v309_v7  ;;  %v264_v27 = vld [vmem:[%s432_s6] ss:$0 sm:$0xff]  ;;  %p314_p0 = scmp.ne.s32.totalorder %s249_s5, %s313_s4  ;;  %p319_p2 = scmp.lt.s32.totalorder %s313_s4, %s313_s4 }
   0xd   :  { %290 = vmatprep.subr.bf16.mxu1 %v337_v1 }
   0xe   :  { %299 = vmatpush3.bf16.msra.mxu0 %v312_v18  ;;  %p320_p3 = por %p319_p2, %p318_p1 }
  0x10   :  { %291 = vmatpush3.bf16.msra.mxu1 %v310_v8  ;;  %p321_p4 = pnand %p320_p3, %p314_p0 }
  0xd9   :  { %v80_v11 = vpop.f32.mrb[0].mxu0 }
  0xda   :  { %v81_v12 = vadd.f32 %v256_v10, %v80_v11  ;;  %v282_v13 = vpop.f32.mrb[1].mxu0 }
  0xdb   :  { %v83_v14 = vpop.f32.mrb[2].mxu0 }
  0xdc   :  { %v86_v15 = vmax.f32 %v81_v12, 0.0  ;;  %v283_v16 = vpop.f32.mrb[3].mxu0 }
  0xde   :  { %v87_v17 = vpack.c.bf16 %v86_v15, %v86_v15 }
  0xe0   :  { %293 = vmatmul.mubr.msk.bf16.vlgmr.msra.gmra.mrb[0].mxu1 %vm127_vm3, %v87_v17 }
 0x1b3   :  { %v165_v20 = vpop.f32.mrb[0].mxu1 }
 0x1b4   :  { %v166_v21 = vadd.f32 %v258_v19, %v165_v20  ;;  %v294_v22 = vpop.f32.mrb[1].mxu1 }
 0x1b5   :  { %v168_v23 = vpop.f32.mrb[2].mxu1 }
 0x1b6   :  { %v171_v24 = vmax.f32 %v166_v21, 0.0  ;;  %v295_v25 = vpop.f32.mrb[3].mxu1 }
 0x1b8   :  { %v172_v26 = vpack.c.bf16 %v171_v24, %v171_v24 }
 0x1ba   :  { %301 = vmatmul.mubr.msk.bf16.vlgmr.msra.gmra.mrb[4].mxu0 %vm196_vm4, %v172_v26 }
 0x28d   :  { %v234_v28 = vpop.f32.mrb[4].mxu0 }
 0x28e   :  { %v235_v29 = vadd.f32 %v264_v27, %v234_v28  ;;  %v302_v30 = vpop.f32.mrb[5].mxu0 }
 0x28f   :  { %v237_v31 = vpop.f32.mrb[6].mxu0 }
 0x290   :  { %v303_v32 = vpop.f32.mrb[7].mxu0  ;;  %241 = vst.msk [vmem:[#allocation2] sm:$0x3] %vm240_vm5, %v235_v29 }
 0x291   :  { %324 = shalt.err (!%p321_p4)
}
 0x292   :  { %s325_s6 = scalar_lea.hbm %s433_s7, 32 }
 0x293   :  { %p326_p5 = scmp.ne.s32.totalorder %s433_s7, %s325_s6  ;;  %p329_p6 = scmp.lt.u32.totalorder %s325_s6, %s433_s7 }
 0x295   :  { %p331_p7 = pnand %p329_p6, %p326_p5 }
 0x297   :  { %334 = shalt.err (!%p331_p7)
}
 0x298   :  { %251 = dma.vmem_to_hbm [thread:$0]  %s249_s5, 32, %s433_s7, [#allocation3]  }
 0x299   :  { %335 = dma.done.wait [#allocation3], 32  }
 0x29a   :  { %336 = vsyncadd [#allocation3], 4294967264 }
 0x29b   :  { %255 = vsyncpa [#allocation3], 1 }

</bundles_post_ra>
